<compile_context>
chip_gen: v5e
topology: v5e:2x2
jax: 0.10.0
libtpu: 0.0.40
codegen_flags: <defaults>
</compile_context>

<pallas_src>
import functools

import jax
import jax.numpy as jnp
from jax.experimental import pallas as pl
from jax.experimental.pallas import tpu as pltpu


def _round_up(x: int, m: int) -> int:
    return ((x + m - 1) // m) * m


def fastrnn_kernel(ab_ref, xw_ref, u_ref, out_ref, h_ref, *, ts, compute_dtype):
    """One grid step: `ts` recurrent timesteps for one batch block.

    ab_ref  : SMEM (2,)             -- [sigmoid(alpha), sigmoid(beta)]
    xw_ref  : VMEM (ts, bb, Hp)     -- precomputed x@W + bias for these steps
    u_ref   : VMEM (Hp, Hp)         -- recurrent weight (padded, compute_dtype)
    out_ref : VMEM (ts, bb, Hp)     -- hidden states written back
    h_ref   : VMEM (bb, Hp) scratch -- recurrent state, persists across time blocks
    """
    t_blk = pl.program_id(1)

    @pl.when(t_blk == 0)
    def _():
        # initial hidden state is zeros (hiddenState=None in BaseRNN)
        h_ref[...] = jnp.zeros_like(h_ref)

    # Hoist the scalar->vector broadcasts out of the unrolled loop.
    a_vec = jnp.full(h_ref.shape, ab_ref[0], dtype=jnp.float32)  # sigmoid(alpha)
    b_vec = jnp.full(h_ref.shape, ab_ref[1], dtype=jnp.float32)  # sigmoid(beta)
    u = u_ref[...]

    def step(s, h):
        pre = xw_ref[s] + jnp.dot(
            h.astype(compute_dtype), u, preferred_element_type=jnp.float32
        )
        h_new = b_vec * h + a_vec * jnp.tanh(pre)
        out_ref[s] = h_new.astype(out_ref.dtype)
        return h_new

    # Partial unroll: enough scheduler visibility without vreg spills.
    h_ref[...] = jax.lax.fori_loop(0, ts, step, h_ref[...], unroll=min(ts, 8))


def fastrnn_forward(x, W, U, bias, alpha, beta, *, ts=32, bb=128,
                    compute_dtype=jnp.float32):
    """FastRNN forward.  x: [T, B, D_in] (time-major). Returns [T, B, H] f32."""
    T, B, D = x.shape
    H = W.shape[1]

    # sublane packing: f32 packs 8 rows/vreg, bf16 packs 16
    sub = 16 if jnp.dtype(compute_dtype) == jnp.dtype(jnp.bfloat16) else 8
    bb = min(_round_up(max(bb, sub), sub), _round_up(B, sub))   # batch block
    B_pad = _round_up(B, bb)
    ts = max(1, min(ts, T))                                     # time block
    T_pad = _round_up(T, ts)
    H_pad = _round_up(H, 128)                                   # lane-dense

    bias = jnp.asarray(bias, jnp.float32).reshape(1, -1)

    # --- Hoist the non-recurrent matmul out of the serial chain -------------
    # Pad params / x BEFORE the einsum so xw is emitted directly in its padded
    # layout (no extra HBM pass over the large activation tensor).
    x_pad = jnp.pad(x.astype(jnp.float32),
                    ((0, T_pad - T), (0, B_pad - B), (0, 0)))
    w_pad = jnp.pad(W.astype(jnp.float32), ((0, 0), (0, H_pad - H)))
    bias_pad = jnp.pad(bias, ((0, 0), (0, H_pad - H)))
    xw = jnp.einsum("tbd,dh->tbh", x_pad, w_pad) + bias_pad     # (Tp, Bp, Hp)

    # Zero-padded rows/cols keep the padded hidden lanes of h exactly zero.
    u_pad = jnp.pad(U.astype(compute_dtype),
                    ((0, H_pad - H), (0, H_pad - H)))

    # Gate scalars computed once; passed to the kernel through SMEM.
    ab = jnp.stack([
        jax.nn.sigmoid(jnp.asarray(alpha, jnp.float32).reshape(())),
        jax.nn.sigmoid(jnp.asarray(beta, jnp.float32).reshape(())),
    ]).astype(jnp.float32)

    grid = (B_pad // bb, T_pad // ts)   # (parallel batch blocks, serial time)

    # VMEM budget: double-buffered xw/out tiles + double-buffered U + h scratch.
    u_item = jnp.dtype(compute_dtype).itemsize
    tile_bytes = ts * bb * H_pad * 4
    needed = 4 * tile_bytes + 2 * H_pad * H_pad * u_item + bb * H_pad * 4
    vmem_limit = int(min(max(needed + (4 << 20), 32 << 20), 96 << 20))

    grid_spec = pltpu.PrefetchScalarGridSpec(
        num_scalar_prefetch=0,
        grid=grid,
        in_specs=[
            # [sigmoid(alpha), sigmoid(beta)] as SMEM scalars
            pl.BlockSpec(memory_space=pltpu.MemorySpace.SMEM),
            # ts timesteps of precomputed x@W + bias per grid step
            pl.BlockSpec((ts, bb, H_pad), lambda b, t: (t, b, 0)),
            # recurrent weight U, resident (constant block index -> no re-DMA)
            pl.BlockSpec((H_pad, H_pad), lambda b, t: (0, 0)),
        ],
        out_specs=pl.BlockSpec((ts, bb, H_pad), lambda b, t: (t, b, 0)),
        scratch_shapes=[pltpu.VMEM((bb, H_pad), jnp.float32)],  # recurrent h
    )

    out = pl.pallas_call(
        functools.partial(fastrnn_kernel, ts=ts, compute_dtype=compute_dtype),
        out_shape=jax.ShapeDtypeStruct((T_pad, B_pad, H_pad), jnp.float32),
        grid_spec=grid_spec,
        compiler_params=pltpu.CompilerParams(
            # batch blocks independent (megacore-shardable); time is serial
            dimension_semantics=("parallel", "arbitrary"),
            vmem_limit_bytes=vmem_limit),
    )(ab, xw, u_pad)

    return out[:T, :B, :H]


def fastrnn_reference(x, W, U, bias, alpha, beta):
    """Pure-JAX reference matching the PyTorch FastRNN forward."""
    sig_a = jax.nn.sigmoid(jnp.asarray(alpha, jnp.float32).reshape(()))
    sig_b = jax.nn.sigmoid(jnp.asarray(beta, jnp.float32).reshape(()))
    bias = jnp.asarray(bias, jnp.float32).reshape(1, -1)

    def step(h, x_t):
        c = jnp.tanh(x_t @ W + h @ U + bias)
        h_new = sig_b * h + sig_a * c
        return h_new, h_new

    h0 = jnp.zeros((x.shape[1], W.shape[1]), jnp.float32)
    _, hs = jax.lax.scan(step, h0, x.astype(jnp.float32))
    return hs


if __name__ == "__main__":
    # small shapes: seq=8, batch=2, input_size=4, hidden=32
    T, B, D, H = 8, 2, 4, 32

    key = jax.random.PRNGKey(0)
    kx, kw, ku = jax.random.split(key, 3)

    x = jax.random.normal(kx, (T, B, D), dtype=jnp.float32)

    # deterministic params mirroring FastRNNCell.__init__ (wRank=uRank=None)
    W = 0.1 * jax.random.normal(kw, (D, H), dtype=jnp.float32)
    U = 0.1 * jax.random.normal(ku, (H, H), dtype=jnp.float32)
    bias = jnp.ones((1, H), dtype=jnp.float32)          # bias_update
    alpha = jnp.full((1, 1), -3.0, dtype=jnp.float32)   # alphaInit
    beta = jnp.full((1, 1), 3.0, dtype=jnp.float32)     # betaInit

    out = fastrnn_forward(x, W, U, bias, alpha, beta,
                          compute_dtype=jnp.float32)
    out = jax.block_until_ready(out)

    ref = fastrnn_reference(x, W, U, bias, alpha, beta)
    assert out.shape == (T, B, H)
    assert jnp.allclose(out, ref, atol=1e-5, rtol=1e-5), "mismatch vs reference"

    print("KERNEL_OK")
</pallas_src>

<mosaic_0001>
module attributes {stable_mosaic.version = 11 : i64} {
  func.func @fastrnn_kernel(%arg0: i32, %arg1: i32, %arg2: memref<2xf32, #tpu.memory_space<smem>>, %arg3: memref<8x8x128xf32, #tpu.memory_space<vmem>>, %arg4: memref<128x128xf32, #tpu.memory_space<vmem>>, %arg5: memref<8x8x128xf32, #tpu.memory_space<vmem>>, %arg6: memref<8x128xf32, #tpu.memory_space<vmem>>) attributes {dimension_semantics = [#tpu.dimension_semantics<parallel>, #tpu.dimension_semantics<arbitrary>], iteration_bounds = array<i64: 1, 1>, scalar_prefetch = 0 : i64, scratch_operands = 1 : i64, tpu.core_type = #tpu.core_type<tc>, window_params = [{transform_indices = @transform_0, window_bounds = array<i64: 2>}, {transform_indices = @transform_1, window_bounds = array<i64: 8, 8, 128>}, {pipeline_mode = #tpu.pipeline_mode<synchronous>, transform_indices = @transform_2, window_bounds = array<i64: 128, 128>}, {transform_indices = @transform_3, window_bounds = array<i64: 8, 8, 128>}]} {
    %c0_i32 = arith.constant 0 : i32
    %0 = arith.cmpi eq, %arg1, %c0_i32 : i32
    %1 = arith.extui %0 : i1 to i32
    %c0_i32_0 = arith.constant 0 : i32
    %2 = arith.cmpi ne, %1, %c0_i32_0 : i32
    scf.if %2 {
      %cst_47 = arith.constant 0.000000e+00 : f32
      %114 = vector.broadcast %cst_47 : f32 to vector<8x128xf32>
      %c0_48 = arith.constant 0 : index
      %c0_49 = arith.constant 0 : index
      %115 = vector.load %arg6[%c0_48, %c0_49] : memref<8x128xf32, #tpu.memory_space<vmem>>, vector<8x128xf32>
      tpu.vector_store %arg6[%c0_48, %c0_49], %114 {strides = array<i32>} : memref<8x128xf32, #tpu.memory_space<vmem>>, vector<8x128xf32>,
    } else {
    }
    %c0 = arith.constant 0 : index
    %3 = memref.load %arg2[%c0] : memref<2xf32, #tpu.memory_space<smem>>
    %4 = vector.broadcast %3 : f32 to vector<8x128xf32>
    %c1 = arith.constant 1 : index
    %5 = memref.load %arg2[%c1] : memref<2xf32, #tpu.memory_space<smem>>
    %6 = vector.broadcast %5 : f32 to vector<8x128xf32>
    %c0_1 = arith.constant 0 : index
    %c0_2 = arith.constant 0 : index
    %7 = vector.load %arg4[%c0_1, %c0_2] : memref<128x128xf32, #tpu.memory_space<vmem>>, vector<128x128xf32>
    %c0_3 = arith.constant 0 : index
    %c0_4 = arith.constant 0 : index
    %8 = vector.load %arg6[%c0_3, %c0_4] : memref<8x128xf32, #tpu.memory_space<vmem>>, vector<8x128xf32>
    %c0_i32_5 = arith.constant 0 : i32
    %9 = arith.index_cast %c0_i32_5 : i32 to index
    %c0_6 = arith.constant 0 : index
    %c0_7 = arith.constant 0 : index
    %10 = vector.load %arg3[%9, %c0_6, %c0_7] : memref<8x8x128xf32, #tpu.memory_space<vmem>>, vector<1x8x128xf32>
    %11 = vector.shape_cast %10 : vector<1x8x128xf32> to vector<8x128xf32>
    %cst = arith.constant dense<0.000000e+00> : vector<8x128xf32>
    %12 = tpu.matmul %8, %7, %cst {dimension_numbers = #tpu.dot_dimension_numbers<[1], [0], [0], [1], [0, 0, 1, 1], [], []>} : vector<8x128xf32>, vector<128x128xf32>, vector<8x128xf32> -> vector<8x128xf32>
    %13 = arith.addf %11, %12 : vector<8x128xf32>
    %14 = arith.mulf %6, %8 : vector<8x128xf32>
    %15 = math.tanh %13 : vector<8x128xf32>
    %16 = arith.mulf %4, %15 : vector<8x128xf32>
    %17 = arith.addf %14, %16 : vector<8x128xf32>
    %18 = arith.index_cast %c0_i32_5 : i32 to index
    %c0_8 = arith.constant 0 : index
    %c0_9 = arith.constant 0 : index
    %19 = vector.load %arg5[%18, %c0_8, %c0_9] : memref<8x8x128xf32, #tpu.memory_space<vmem>>, vector<1x8x128xf32>
    %20 = vector.shape_cast %19 : vector<1x8x128xf32> to vector<8x128xf32>
    %21 = vector.shape_cast %17 : vector<8x128xf32> to vector<1x8x128xf32>
    tpu.vector_store %arg5[%18, %c0_8, %c0_9], %21 {strides = array<i32>} : memref<8x8x128xf32, #tpu.memory_space<vmem>>, vector<1x8x128xf32>,
    %c1_i32 = arith.constant 1 : i32
    %22 = arith.index_cast %c1_i32 : i32 to index
    %c0_10 = arith.constant 0 : index
    %c0_11 = arith.constant 0 : index
    %23 = vector.load %arg3[%22, %c0_10, %c0_11] : memref<8x8x128xf32, #tpu.memory_space<vmem>>, vector<1x8x128xf32>
    %24 = vector.shape_cast %23 : vector<1x8x128xf32> to vector<8x128xf32>
    %cst_12 = arith.constant dense<0.000000e+00> : vector<8x128xf32>
    %25 = tpu.matmul %17, %7, %cst_12 {dimension_numbers = #tpu.dot_dimension_numbers<[1], [0], [0], [1], [0, 0, 1, 1], [], []>} : vector<8x128xf32>, vector<128x128xf32>, vector<8x128xf32> -> vector<8x128xf32>
    %26 = arith.addf %24, %25 : vector<8x128xf32>
    %27 = arith.mulf %6, %17 : vector<8x128xf32>
    %28 = math.tanh %26 : vector<8x128xf32>
    %29 = arith.mulf %4, %28 : vector<8x128xf32>
    %30 = arith.addf %27, %29 : vector<8x128xf32>
    %31 = arith.index_cast %c1_i32 : i32 to index
    %c0_13 = arith.constant 0 : index
    %c0_14 = arith.constant 0 : index
    %32 = vector.load %arg5[%31, %c0_13, %c0_14] : memref<8x8x128xf32, #tpu.memory_space<vmem>>, vector<1x8x128xf32>
    %33 = vector.shape_cast %32 : vector<1x8x128xf32> to vector<8x128xf32>
    %34 = vector.shape_cast %30 : vector<8x128xf32> to vector<1x8x128xf32>
    tpu.vector_store %arg5[%31, %c0_13, %c0_14], %34 {strides = array<i32>} : memref<8x8x128xf32, #tpu.memory_space<vmem>>, vector<1x8x128xf32>,
    %c2_i32 = arith.constant 2 : i32
    %35 = arith.index_cast %c2_i32 : i32 to index
    %c0_15 = arith.constant 0 : index
    %c0_16 = arith.constant 0 : index
    %36 = vector.load %arg3[%35, %c0_15, %c0_16] : memref<8x8x128xf32, #tpu.memory_space<vmem>>, vector<1x8x128xf32>
    %37 = vector.shape_cast %36 : vector<1x8x128xf32> to vector<8x128xf32>
    %cst_17 = arith.constant dense<0.000000e+00> : vector<8x128xf32>
    %38 = tpu.matmul %30, %7, %cst_17 {dimension_numbers = #tpu.dot_dimension_numbers<[1], [0], [0], [1], [0, 0, 1, 1], [], []>} : vector<8x128xf32>, vector<128x128xf32>, vector<8x128xf32> -> vector<8x128xf32>
    %39 = arith.addf %37, %38 : vector<8x128xf32>
    %40 = arith.mulf %6, %30 : vector<8x128xf32>
    %41 = math.tanh %39 : vector<8x128xf32>
    %42 = arith.mulf %4, %41 : vector<8x128xf32>
    %43 = arith.addf %40, %42 : vector<8x128xf32>
    %44 = arith.index_cast %c2_i32 : i32 to index
    %c0_18 = arith.constant 0 : index
    %c0_19 = arith.constant 0 : index
    %45 = vector.load %arg5[%44, %c0_18, %c0_19] : memref<8x8x128xf32, #tpu.memory_space<vmem>>, vector<1x8x128xf32>
    %46 = vector.shape_cast %45 : vector<1x8x128xf32> to vector<8x128xf32>
    %47 = vector.shape_cast %43 : vector<8x128xf32> to vector<1x8x128xf32>
    tpu.vector_store %arg5[%44, %c0_18, %c0_19], %47 {strides = array<i32>} : memref<8x8x128xf32, #tpu.memory_space<vmem>>, vector<1x8x128xf32>,
    %c3_i32 = arith.constant 3 : i32
    %48 = arith.index_cast %c3_i32 : i32 to index
    %c0_20 = arith.constant 0 : index
    %c0_21 = arith.constant 0 : index
    %49 = vector.load %arg3[%48, %c0_20, %c0_21] : memref<8x8x128xf32, #tpu.memory_space<vmem>>, vector<1x8x128xf32>
    %50 = vector.shape_cast %49 : vector<1x8x128xf32> to vector<8x128xf32>
    %cst_22 = arith.constant dense<0.000000e+00> : vector<8x128xf32>
    %51 = tpu.matmul %43, %7, %cst_22 {dimension_numbers = #tpu.dot_dimension_numbers<[1], [0], [0], [1], [0, 0, 1, 1], [], []>} : vector<8x128xf32>, vector<128x128xf32>, vector<8x128xf32> -> vector<8x128xf32>
    %52 = arith.addf %50, %51 : vector<8x128xf32>
    %53 = arith.mulf %6, %43 : vector<8x128xf32>
    %54 = math.tanh %52 : vector<8x128xf32>
    %55 = arith.mulf %4, %54 : vector<8x128xf32>
    %56 = arith.addf %53, %55 : vector<8x128xf32>
    %57 = arith.index_cast %c3_i32 : i32 to index
    %c0_23 = arith.constant 0 : index
    %c0_24 = arith.constant 0 : index
    %58 = vector.load %arg5[%57, %c0_23, %c0_24] : memref<8x8x128xf32, #tpu.memory_space<vmem>>, vector<1x8x128xf32>
    %59 = vector.shape_cast %58 : vector<1x8x128xf32> to vector<8x128xf32>
    %60 = vector.shape_cast %56 : vector<8x128xf32> to vector<1x8x128xf32>
    tpu.vector_store %arg5[%57, %c0_23, %c0_24], %60 {strides = array<i32>} : memref<8x8x128xf32, #tpu.memory_space<vmem>>, vector<1x8x128xf32>,
    %c4_i32 = arith.constant 4 : i32
    %61 = arith.index_cast %c4_i32 : i32 to index
    %c0_25 = arith.constant 0 : index
    %c0_26 = arith.constant 0 : index
    %62 = vector.load %arg3[%61, %c0_25, %c0_26] : memref<8x8x128xf32, #tpu.memory_space<vmem>>, vector<1x8x128xf32>
    %63 = vector.shape_cast %62 : vector<1x8x128xf32> to vector<8x128xf32>
    %cst_27 = arith.constant dense<0.000000e+00> : vector<8x128xf32>
    %64 = tpu.matmul %56, %7, %cst_27 {dimension_numbers = #tpu.dot_dimension_numbers<[1], [0], [0], [1], [0, 0, 1, 1], [], []>} : vector<8x128xf32>, vector<128x128xf32>, vector<8x128xf32> -> vector<8x128xf32>
    %65 = arith.addf %63, %64 : vector<8x128xf32>
    %66 = arith.mulf %6, %56 : vector<8x128xf32>
    %67 = math.tanh %65 : vector<8x128xf32>
    %68 = arith.mulf %4, %67 : vector<8x128xf32>
    %69 = arith.addf %66, %68 : vector<8x128xf32>
    %70 = arith.index_cast %c4_i32 : i32 to index
    %c0_28 = arith.constant 0 : index
    %c0_29 = arith.constant 0 : index
    %71 = vector.load %arg5[%70, %c0_28, %c0_29] : memref<8x8x128xf32, #tpu.memory_space<vmem>>, vector<1x8x128xf32>
    %72 = vector.shape_cast %71 : vector<1x8x128xf32> to vector<8x128xf32>
    %73 = vector.shape_cast %69 : vector<8x128xf32> to vector<1x8x128xf32>
    tpu.vector_store %arg5[%70, %c0_28, %c0_29], %73 {strides = array<i32>} : memref<8x8x128xf32, #tpu.memory_space<vmem>>, vector<1x8x128xf32>,
    %c5_i32 = arith.constant 5 : i32
    %74 = arith.index_cast %c5_i32 : i32 to index
    %c0_30 = arith.constant 0 : index
    %c0_31 = arith.constant 0 : index
    %75 = vector.load %arg3[%74, %c0_30, %c0_31] : memref<8x8x128xf32, #tpu.memory_space<vmem>>, vector<1x8x128xf32>
    %76 = vector.shape_cast %75 : vector<1x8x128xf32> to vector<8x128xf32>
    %cst_32 = arith.constant dense<0.000000e+00> : vector<8x128xf32>
    %77 = tpu.matmul %69, %7, %cst_32 {dimension_numbers = #tpu.dot_dimension_numbers<[1], [0], [0], [1], [0, 0, 1, 1], [], []>} : vector<8x128xf32>, vector<128x128xf32>, vector<8x128xf32> -> vector<8x128xf32>
    %78 = arith.addf %76, %77 : vector<8x128xf32>
    %79 = arith.mulf %6, %69 : vector<8x128xf32>
    %80 = math.tanh %78 : vector<8x128xf32>
    %81 = arith.mulf %4, %80 : vector<8x128xf32>
    %82 = arith.addf %79, %81 : vector<8x128xf32>
    %83 = arith.index_cast %c5_i32 : i32 to index
    %c0_33 = arith.constant 0 : index
    %c0_34 = arith.constant 0 : index
    %84 = vector.load %arg5[%83, %c0_33, %c0_34] : memref<8x8x128xf32, #tpu.memory_space<vmem>>, vector<1x8x128xf32>
    %85 = vector.shape_cast %84 : vector<1x8x128xf32> to vector<8x128xf32>
    %86 = vector.shape_cast %82 : vector<8x128xf32> to vector<1x8x128xf32>
    tpu.vector_store %arg5[%83, %c0_33, %c0_34], %86 {strides = array<i32>} : memref<8x8x128xf32, #tpu.memory_space<vmem>>, vector<1x8x128xf32>,
    %c6_i32 = arith.constant 6 : i32
    %87 = arith.index_cast %c6_i32 : i32 to index
    %c0_35 = arith.constant 0 : index
    %c0_36 = arith.constant 0 : index
    %88 = vector.load %arg3[%87, %c0_35, %c0_36] : memref<8x8x128xf32, #tpu.memory_space<vmem>>, vector<1x8x128xf32>
    %89 = vector.shape_cast %88 : vector<1x8x128xf32> to vector<8x128xf32>
    %cst_37 = arith.constant dense<0.000000e+00> : vector<8x128xf32>
    %90 = tpu.matmul %82, %7, %cst_37 {dimension_numbers = #tpu.dot_dimension_numbers<[1], [0], [0], [1], [0, 0, 1, 1], [], []>} : vector<8x128xf32>, vector<128x128xf32>, vector<8x128xf32> -> vector<8x128xf32>
    %91 = arith.addf %89, %90 : vector<8x128xf32>
    %92 = arith.mulf %6, %82 : vector<8x128xf32>
    %93 = math.tanh %91 : vector<8x128xf32>
    %94 = arith.mulf %4, %93 : vector<8x128xf32>
    %95 = arith.addf %92, %94 : vector<8x128xf32>
    %96 = arith.index_cast %c6_i32 : i32 to index
    %c0_38 = arith.constant 0 : index
    %c0_39 = arith.constant 0 : index
    %97 = vector.load %arg5[%96, %c0_38, %c0_39] : memref<8x8x128xf32, #tpu.memory_space<vmem>>, vector<1x8x128xf32>
    %98 = vector.shape_cast %97 : vector<1x8x128xf32> to vector<8x128xf32>
    %99 = vector.shape_cast %95 : vector<8x128xf32> to vector<1x8x128xf32>
    tpu.vector_store %arg5[%96, %c0_38, %c0_39], %99 {strides = array<i32>} : memref<8x8x128xf32, #tpu.memory_space<vmem>>, vector<1x8x128xf32>,
    %c7_i32 = arith.constant 7 : i32
    %100 = arith.index_cast %c7_i32 : i32 to index
    %c0_40 = arith.constant 0 : index
    %c0_41 = arith.constant 0 : index
    %101 = vector.load %arg3[%100, %c0_40, %c0_41] : memref<8x8x128xf32, #tpu.memory_space<vmem>>, vector<1x8x128xf32>
    %102 = vector.shape_cast %101 : vector<1x8x128xf32> to vector<8x128xf32>
    %cst_42 = arith.constant dense<0.000000e+00> : vector<8x128xf32>
    %103 = tpu.matmul %95, %7, %cst_42 {dimension_numbers = #tpu.dot_dimension_numbers<[1], [0], [0], [1], [0, 0, 1, 1], [], []>} : vector<8x128xf32>, vector<128x128xf32>, vector<8x128xf32> -> vector<8x128xf32>
    %104 = arith.addf %102, %103 : vector<8x128xf32>
    %105 = arith.mulf %6, %95 : vector<8x128xf32>
    %106 = math.tanh %104 : vector<8x128xf32>
    %107 = arith.mulf %4, %106 : vector<8x128xf32>
    %108 = arith.addf %105, %107 : vector<8x128xf32>
    %109 = arith.index_cast %c7_i32 : i32 to index
    %c0_43 = arith.constant 0 : index
    %c0_44 = arith.constant 0 : index
    %110 = vector.load %arg5[%109, %c0_43, %c0_44] : memref<8x8x128xf32, #tpu.memory_space<vmem>>, vector<1x8x128xf32>
    %111 = vector.shape_cast %110 : vector<1x8x128xf32> to vector<8x128xf32>
    %112 = vector.shape_cast %108 : vector<8x128xf32> to vector<1x8x128xf32>
    tpu.vector_store %arg5[%109, %c0_43, %c0_44], %112 {strides = array<i32>} : memref<8x8x128xf32, #tpu.memory_space<vmem>>, vector<1x8x128xf32>,
    %c8_i32 = arith.constant 8 : i32
    %c0_45 = arith.constant 0 : index
    %c0_46 = arith.constant 0 : index
    %113 = vector.load %arg6[%c0_45, %c0_46] : memref<8x128xf32, #tpu.memory_space<vmem>>, vector<8x128xf32>
    tpu.vector_store %arg6[%c0_45, %c0_46], %108 {strides = array<i32>} : memref<8x128xf32, #tpu.memory_space<vmem>>, vector<8x128xf32>,
    return
  }
  func.func @transform_0(%arg0: i32, %arg1: i32) -> i32 {
    %c0_i32 = arith.constant 0 : i32
    %c0_i32_0 = arith.constant 0 : i32
    return %c0_i32 : i32
  }
  func.func @transform_1(%arg0: i32, %arg1: i32) -> (i32, i32, i32) {
    %c0_i32 = arith.constant 0 : i32
    %c0_i32_0 = arith.constant 0 : i32
    return %arg1, %arg0, %c0_i32 : i32, i32, i32
  }
  func.func @transform_2(%arg0: i32, %arg1: i32) -> (i32, i32) {
    %c0_i32 = arith.constant 0 : i32
    %c0_i32_0 = arith.constant 0 : i32
    %c0_i32_1 = arith.constant 0 : i32
    return %c0_i32, %c0_i32_0 : i32, i32
  }
  func.func @transform_3(%arg0: i32, %arg1: i32) -> (i32, i32, i32) {
    %c0_i32 = arith.constant 0 : i32
    %c0_i32_0 = arith.constant 0 : i32
    return %arg1, %arg0, %c0_i32 : i32, i32, i32
  }
}

</mosaic_0001>

<bundles_post_ra>
// kernel: tpu_custom_call.1
= control target key start
LH: loop header
LB: loop body
LE: loop exit
PB: predicated region body
PF: predicated region fallthrough
CT: control target
= control target key end

     0   :  { %8 = vsyncpa [#allocation6], 0  ;;  %s682_s0 = inlined_call_operand.hbm [shape: f32[2], index: 0, kind: input, shape index: {}]   ;;  %s683_s1 = inlined_call_operand.hbm [shape: f32[8,8,128], index: 1, kind: input, shape index: {}]   ;;  %s684_s2 = inlined_call_operand.hbm [shape: f32[128,128], index: 2, kind: input, shape index: {}]   ;;  %s685_s3 = inlined_call_operand.hbm [shape: f32[8,8,128], index: 3, kind: output, shape index: {}]  }
   0x1   :  { %9 = vsyncpa [#allocation4], 0 }
   0x2   :  { %10 = vsyncpa [#allocation9], 0 }
   0x3   :  { %11 = vsyncpa [#allocation5], 0  ;;  %s17_s14 = sshll.u32 %s682_s0, 4  ;;  %s25_s17 = sshll.u32 %s683_s1, 4  ;;  %s18_s14 = int_to_ptr.hbm [resolvable:$true] %s17_s14  ;;  %s26_s17 = int_to_ptr.hbm [resolvable:$true] %s25_s17 }
   0x4   :  { %s454_s18 = smov [#allocation3]   ;;  %s455_s19 = smov [#allocation7]  }
   0x5   :  { %20 = dma.hbm_to_smem %s18_s14, 16, %s454_s18, [#allocation6]  }
   0x6   :  { %s27_s20 = sshll.u32 %s455_s19, 4  ;;  %s456_s21 = smov 128   ;;  %s28_s20 = int_to_ptr.vmem [resolvable:$true] %s27_s20 }
   0x7   :  { %s457_s22 = smov 8   ;;  %s38_s0 = sshll.u32 %s684_s2, 4  ;;  %s39_s0 = int_to_ptr.hbm [resolvable:$true] %s38_s0 }
   0x8   :  { %33 = dma.hbm_to_vmem [thread:$0]  %s26_s17, 1024, %s28_s20, [#allocation4], %s456_s21, %s456_s21, %s457_s22  }
   0x9   :  { %s458_s25 = smov [#allocation8]  }
   0xa   :  { %s40_s26 = sshll.u32 %s458_s25, 4  ;;  %s41_s26 = int_to_ptr.vmem [resolvable:$true] %s40_s26 }
   0xb   :  { %46 = dma.hbm_to_vmem [thread:$0]  %s39_s0, 2048, %s41_s26, [#allocation9], %s456_s21, %s456_s21, %s457_s22  }
   0xc   :  { %446 = dma.done.wait [#allocation6], 16  }
   0xd   :  { %447 = vsyncadd [#allocation6], 4294967280 }
   0xe   :  { %448 = dma.done.wait [#allocation4], 1024  }
   0xf   :  { %449 = vsyncadd [#allocation4], 4294966272 }
  0x10   :  { %450 = dma.done.wait [#allocation9], 2048  }
  0x11   :  { %451 = vsyncadd [#allocation9], 4294965248 }
  0x12   :  { %59 = sfence }
  0x13   :  { %v496_v0 = vld [vmem:[#allocation8 + $0x78] sm:$0xff]  ;;  %v498_v1 = vld [vmem:[#allocation8 + $0x70] sm:$0xff]  ;;  %v502_v2 = vld [vmem:[#allocation8 + $0x68] sm:$0xff]  ;;  %v459_v16 = vmov 0.0   ;;  %s338_s1 = sld [smem:[#allocation3 + $0x1]]  ;;  %s460_s27 = smov [#allocation10]  }
  0x14   :  { %87 = vmatpush.msra.mxu0 %v496_v0  ;;  %115 = vmatpush.msra.mxu1 %v496_v0  ;;  %v508_v3 = vld [vmem:[#allocation8 + $0x60] sm:$0xff]  ;;  %v514_v4 = vld [vmem:[#allocation8 + $0x58] sm:$0xff]  ;;  %v520_v5 = vld [vmem:[#allocation8 + $0x50] sm:$0xff]  ;;  %s65_s2 = sld [smem:[#allocation3]]  ;;  %s321_s28 = sshll.u32 %s460_s27, 4  ;;  %s322_s28 = int_to_ptr.vmem [resolvable:$true] %s321_s28 }
  0x15   :  { %144 = vmatpush.msra.mxu2 %v496_v0  ;;  %173 = vmatpush.msra.mxu3 %v496_v0  ;;  %v526_v6 = vld [vmem:[#allocation8 + $0x48] sm:$0xff]  ;;  %v532_v7 = vld [vmem:[#allocation8 + $0x40] sm:$0xff]  ;;  %v538_v8 = vld [vmem:[#allocation8 + $0x38] sm:$0xff]  ;;  %s323_s4 = sshll.u32 %s685_s3, 4  ;;  %s324_s4 = int_to_ptr.hbm [resolvable:$true] %s323_s4 }
  0x16   :  { %88 = vmatpush.msra.mxu0 %v498_v1  ;;  %116 = vmatpush.msra.mxu1 %v498_v1  ;;  %v544_v9 = vld [vmem:[#allocation8 + $0x30] sm:$0xff]  ;;  %v550_v10 = vld [vmem:[#allocation8 + $0x28] sm:$0xff]  ;;  %v556_v11 = vld [vmem:[#allocation8 + $0x20] sm:$0xff] }
  0x17   :  { %145 = vmatpush.msra.mxu2 %v498_v1  ;;  %174 = vmatpush.msra.mxu3 %v498_v1  ;;  %v562_v12 = vld [vmem:[#allocation8 + $0x18] sm:$0xff]  ;;  %v568_v13 = vld [vmem:[#allocation8 + $0x10] sm:$0xff]  ;;  %v574_v14 = vld [vmem:[#allocation8 + $0x8] sm:$0xff] }
  0x18   :  { %89 = vmatpush.msra.mxu0 %v502_v2  ;;  %117 = vmatpush.msra.mxu1 %v502_v2  ;;  %v580_v15 = vld [vmem:[#allocation8] sm:$0xff]  ;;  %v114_v26 = vld [vmem:[#allocation7 + $0x8] sm:$0xff]  ;;  %v143_v33 = vld [vmem:[#allocation7 + $0x10] sm:$0xff] }
  0x19   :  { %146 = vmatpush.msra.mxu2 %v502_v2  ;;  %175 = vmatpush.msra.mxu3 %v502_v2  ;;  %v86_v17 = vld [vmem:[#allocation7] sm:$0xff]  ;;  %v656_v20 = vstv %s338_s1  ;;  %v172_v40 = vld [vmem:[#allocation7 + $0x18] sm:$0xff]  ;;  %v230_v54 = vld [vmem:[#allocation7 + $0x28] sm:$0xff] }
  0x1a   :  { %90 = vmatpush.msra.mxu0 %v508_v3  ;;  %118 = vmatpush.msra.mxu1 %v508_v3  ;;  %v658_v21 = vstv %s65_s2  ;;  %v108_v22 = vmul.f32 0.0, %v656_v20  ;;  %v201_v47 = vld [vmem:[#allocation7 + $0x20] sm:$0xff]  ;;  %v259_v61 = vld [vmem:[#allocation7 + $0x30] sm:$0xff] }
  0x1b   :  { %147 = vmatpush.msra.mxu2 %v508_v3  ;;  %176 = vmatpush.msra.mxu3 %v508_v3 }
  0x1c   :  { %91 = vmatpush.msra.mxu0 %v514_v4  ;;  %119 = vmatpush.msra.mxu1 %v514_v4 }
  0x1d   :  { %148 = vmatpush.msra.mxu2 %v514_v4  ;;  %177 = vmatpush.msra.mxu3 %v514_v4 }
  0x1e   :  { %92 = vmatpush.msra.mxu0 %v520_v5  ;;  %120 = vmatpush.msra.mxu1 %v520_v5 }
  0x1f   :  { %149 = vmatpush.msra.mxu2 %v520_v5  ;;  %178 = vmatpush.msra.mxu3 %v520_v5 }
  0x20   :  { %93 = vmatpush.msra.mxu0 %v526_v6  ;;  %121 = vmatpush.msra.mxu1 %v526_v6 }
  0x21   :  { %150 = vmatpush.msra.mxu2 %v526_v6  ;;  %179 = vmatpush.msra.mxu3 %v526_v6 }
  0x22   :  { %94 = vmatpush.msra.mxu0 %v532_v7  ;;  %122 = vmatpush.msra.mxu1 %v532_v7 }
  0x23   :  { %151 = vmatpush.msra.mxu2 %v532_v7  ;;  %180 = vmatpush.msra.mxu3 %v532_v7 }
  0x24   :  { %95 = vmatpush.msra.mxu0 %v538_v8  ;;  %123 = vmatpush.msra.mxu1 %v538_v8 }
  0x25   :  { %152 = vmatpush.msra.mxu2 %v538_v8  ;;  %181 = vmatpush.msra.mxu3 %v538_v8 }
  0x26   :  { %96 = vmatpush.msra.mxu0 %v544_v9  ;;  %124 = vmatpush.msra.mxu1 %v544_v9 }
  0x27   :  { %153 = vmatpush.msra.mxu2 %v544_v9  ;;  %182 = vmatpush.msra.mxu3 %v544_v9 }
  0x28   :  { %97 = vmatpush.msra.mxu0 %v550_v10  ;;  %125 = vmatpush.msra.mxu1 %v550_v10 }
  0x29   :  { %154 = vmatpush.msra.mxu2 %v550_v10  ;;  %183 = vmatpush.msra.mxu3 %v550_v10 }
  0x2a   :  { %98 = vmatpush.msra.mxu0 %v556_v11  ;;  %126 = vmatpush.msra.mxu1 %v556_v11 }
  0x2b   :  { %155 = vmatpush.msra.mxu2 %v556_v11  ;;  %184 = vmatpush.msra.mxu3 %v556_v11 }
  0x2c   :  { %99 = vmatpush.msra.mxu0 %v562_v12  ;;  %127 = vmatpush.msra.mxu1 %v562_v12 }
  0x2d   :  { %156 = vmatpush.msra.mxu2 %v562_v12  ;;  %185 = vmatpush.msra.mxu3 %v562_v12 }
  0x2e   :  { %100 = vmatpush.msra.mxu0 %v568_v13  ;;  %128 = vmatpush.msra.mxu1 %v568_v13 }
  0x2f   :  { %157 = vmatpush.msra.mxu2 %v568_v13  ;;  %186 = vmatpush.msra.mxu3 %v568_v13 }
  0x30   :  { %101 = vmatpush.msra.mxu0 %v574_v14  ;;  %129 = vmatpush.msra.mxu1 %v574_v14 }
  0x31   :  { %158 = vmatpush.msra.mxu2 %v574_v14  ;;  %187 = vmatpush.msra.mxu3 %v574_v14 }
  0x32   :  { %102 = vmatpush.msra.mxu0 %v580_v15  ;;  %130 = vmatpush.msra.mxu1 %v580_v15 }
  0x33   :  { %103 = vmatmul.f32.vlgmr.msra.gmra.mxu0 %v459_v16  ;;  %159 = vmatpush.msra.mxu2 %v580_v15 }
  0x34   :  { %188 = vmatpush.msra.mxu3 %v580_v15  ;;  %202 = vmatpush.msrb.mxu0 %v496_v0 }
  0x35   :  { %231 = vmatpush.msrb.mxu1 %v496_v0  ;;  %260 = vmatpush.msrb.mxu2 %v496_v0 }
  0x36   :  { %203 = vmatpush.msrb.mxu0 %v498_v1  ;;  %289 = vmatpush.msrb.mxu3 %v496_v0 }
  0x37   :  { %232 = vmatpush.msrb.mxu1 %v498_v1  ;;  %261 = vmatpush.msrb.mxu2 %v498_v1 }
  0x38   :  { %204 = vmatpush.msrb.mxu0 %v502_v2  ;;  %290 = vmatpush.msrb.mxu3 %v498_v1 }
  0x39   :  { %233 = vmatpush.msrb.mxu1 %v502_v2  ;;  %262 = vmatpush.msrb.mxu2 %v502_v2 }
  0x3a   :  { %205 = vmatpush.msrb.mxu0 %v508_v3  ;;  %291 = vmatpush.msrb.mxu3 %v502_v2 }
  0x3b   :  { %234 = vmatpush.msrb.mxu1 %v508_v3  ;;  %263 = vmatpush.msrb.mxu2 %v508_v3 }
  0x3c   :  { %206 = vmatpush.msrb.mxu0 %v514_v4  ;;  %292 = vmatpush.msrb.mxu3 %v508_v3 }
  0x3d   :  { %235 = vmatpush.msrb.mxu1 %v514_v4  ;;  %264 = vmatpush.msrb.mxu2 %v514_v4 }
  0x3e   :  { %207 = vmatpush.msrb.mxu0 %v520_v5  ;;  %293 = vmatpush.msrb.mxu3 %v514_v4  ;;  %v288_v4 = vld [vmem:[#allocation7 + $0x38] sm:$0xff] }
  0x3f   :  { %236 = vmatpush.msrb.mxu1 %v520_v5  ;;  %265 = vmatpush.msrb.mxu2 %v520_v5 }
  0x40   :  { %208 = vmatpush.msrb.mxu0 %v526_v6  ;;  %294 = vmatpush.msrb.mxu3 %v520_v5 }
  0x41   :  { %237 = vmatpush.msrb.mxu1 %v526_v6  ;;  %266 = vmatpush.msrb.mxu2 %v526_v6 }
  0x42   :  { %209 = vmatpush.msrb.mxu0 %v532_v7  ;;  %295 = vmatpush.msrb.mxu3 %v526_v6 }
  0x43   :  { %238 = vmatpush.msrb.mxu1 %v532_v7  ;;  %267 = vmatpush.msrb.mxu2 %v532_v7 }
  0x44   :  { %210 = vmatpush.msrb.mxu0 %v538_v8  ;;  %296 = vmatpush.msrb.mxu3 %v532_v7 }
  0x45   :  { %239 = vmatpush.msrb.mxu1 %v538_v8  ;;  %268 = vmatpush.msrb.mxu2 %v538_v8 }
  0x46   :  { %211 = vmatpush.msrb.mxu0 %v544_v9  ;;  %297 = vmatpush.msrb.mxu3 %v538_v8 }
  0x47   :  { %240 = vmatpush.msrb.mxu1 %v544_v9  ;;  %269 = vmatpush.msrb.mxu2 %v544_v9 }
  0x48   :  { %212 = vmatpush.msrb.mxu0 %v550_v10  ;;  %298 = vmatpush.msrb.mxu3 %v544_v9 }
  0x49   :  { %241 = vmatpush.msrb.mxu1 %v550_v10  ;;  %270 = vmatpush.msrb.mxu2 %v550_v10 }
  0x4a   :  { %213 = vmatpush.msrb.mxu0 %v556_v11  ;;  %299 = vmatpush.msrb.mxu3 %v550_v10 }
  0x4b   :  { %242 = vmatpush.msrb.mxu1 %v556_v11  ;;  %271 = vmatpush.msrb.mxu2 %v556_v11 }
  0x4c   :  { %214 = vmatpush.msrb.mxu0 %v562_v12  ;;  %300 = vmatpush.msrb.mxu3 %v556_v11 }
  0x4d   :  { %243 = vmatpush.msrb.mxu1 %v562_v12  ;;  %272 = vmatpush.msrb.mxu2 %v562_v12 }
  0x4e   :  { %215 = vmatpush.msrb.mxu0 %v568_v13  ;;  %301 = vmatpush.msrb.mxu3 %v562_v12 }
  0x4f   :  { %244 = vmatpush.msrb.mxu1 %v568_v13  ;;  %273 = vmatpush.msrb.mxu2 %v568_v13 }
  0x50   :  { %216 = vmatpush.msrb.mxu0 %v574_v14  ;;  %302 = vmatpush.msrb.mxu3 %v568_v13 }
  0x51   :  { %245 = vmatpush.msrb.mxu1 %v574_v14  ;;  %274 = vmatpush.msrb.mxu2 %v574_v14 }
  0x52   :  { %217 = vmatpush.msrb.mxu0 %v580_v15  ;;  %303 = vmatpush.msrb.mxu3 %v574_v14 }
  0x53   :  { %246 = vmatpush.msrb.mxu1 %v580_v15  ;;  %275 = vmatpush.msrb.mxu2 %v580_v15 }
  0x54   :  { %304 = vmatpush.msrb.mxu3 %v580_v15 }
  0xb0   :  { %v104_v18 = vpop.f32.mrf.mxu0 }
  0xb1   :  { %v107_v19 = vadd.f32 %v104_v18, %v86_v17 }
  0xb3   :  { %346 = vtanh.f32 %v107_v19 }
  0xb9   :  { %v347_v23 = vpop.eup %346 }
  0xba   :  { %v110_v24 = vmul.f32 %v347_v23, %v658_v21 }
  0xbc   :  { %v111_v25 = vadd.f32 %v110_v24, %v108_v22 }
  0xbe   :  { %112 = vst [vmem:[#allocation10] sm:$0xff] %v111_v25  ;;  %131 = vmatmul.f32.vlgmr.msra.gmra.mxu1 %v111_v25  ;;  %v136_v30 = vmul.f32 %v111_v25, %v656_v20 }
 0x13b   :  { %v132_v27 = vpop.f32.mrf.mxu1 }
 0x13c   :  { %v135_v28 = vadd.f32 %v132_v27, %v114_v26 }
 0x13e   :  { %348 = vtanh.f32 %v135_v28 }
 0x144   :  { %v349_v29 = vpop.eup %348 }
 0x145   :  { %v138_v31 = vmul.f32 %v349_v29, %v658_v21 }
 0x147   :  { %v139_v32 = vadd.f32 %v138_v31, %v136_v30 }
 0x149   :  { %141 = vst [vmem:[#allocation10 + $0x8] sm:$0xff] %v139_v32  ;;  %160 = vmatmul.f32.vlgmr.msra.gmra.mxu2 %v139_v32  ;;  %v165_v37 = vmul.f32 %v139_v32, %v656_v20 }
 0x1cc   :  { %v161_v34 = vpop.f32.mrf.mxu2 }
 0x1cd   :  { %v164_v35 = vadd.f32 %v161_v34, %v143_v33 }
 0x1cf   :  { %350 = vtanh.f32 %v164_v35 }
 0x1d5   :  { %v351_v36 = vpop.eup %350 }
 0x1d6   :  { %v167_v38 = vmul.f32 %v351_v36, %v658_v21 }
 0x1d8   :  { %v168_v39 = vadd.f32 %v167_v38, %v165_v37 }
 0x1da   :  { %170 = vst [vmem:[#allocation10 + $0x10] sm:$0xff] %v168_v39  ;;  %189 = vmatmul.f32.vlgmr.msra.gmra.mxu3 %v168_v39  ;;  %v194_v44 = vmul.f32 %v168_v39, %v656_v20 }
 0x25d   :  { %v190_v41 = vpop.f32.mrf.mxu3 }
 0x25e   :  { %v193_v42 = vadd.f32 %v190_v41, %v172_v40 }
 0x260   :  { %352 = vtanh.f32 %v193_v42 }
 0x266   :  { %v353_v43 = vpop.eup %352 }
 0x267   :  { %v196_v45 = vmul.f32 %v353_v43, %v658_v21 }
 0x269   :  { %v197_v46 = vadd.f32 %v196_v45, %v194_v44 }
 0x26b   :  { %199 = vst [vmem:[#allocation10 + $0x18] sm:$0xff] %v197_v46  ;;  %218 = vmatmul.f32.vlgmr.msrb.gmra.mxu0 %v197_v46  ;;  %v223_v51 = vmul.f32 %v197_v46, %v656_v20 }
 0x2e8   :  { %v219_v48 = vpop.f32.mrf.mxu0 }
 0x2e9   :  { %v222_v49 = vadd.f32 %v219_v48, %v201_v47 }
 0x2eb   :  { %354 = vtanh.f32 %v222_v49 }
 0x2f1   :  { %v355_v50 = vpop.eup %354 }
 0x2f2   :  { %v225_v52 = vmul.f32 %v355_v50, %v658_v21 }
 0x2f4   :  { %v226_v53 = vadd.f32 %v225_v52, %v223_v51 }
 0x2f6   :  { %228 = vst [vmem:[#allocation10 + $0x20] sm:$0xff] %v226_v53  ;;  %247 = vmatmul.f32.vlgmr.msrb.gmra.mxu1 %v226_v53  ;;  %v252_v58 = vmul.f32 %v226_v53, %v656_v20 }
 0x373   :  { %v248_v55 = vpop.f32.mrf.mxu1 }
 0x374   :  { %v251_v56 = vadd.f32 %v248_v55, %v230_v54 }
 0x376   :  { %356 = vtanh.f32 %v251_v56 }
 0x37c   :  { %v357_v57 = vpop.eup %356 }
 0x37d   :  { %v254_v59 = vmul.f32 %v357_v57, %v658_v21 }
 0x37f   :  { %v255_v60 = vadd.f32 %v254_v59, %v252_v58 }
 0x381   :  { %257 = vst [vmem:[#allocation10 + $0x28] sm:$0xff] %v255_v60  ;;  %276 = vmatmul.f32.vlgmr.msrb.gmra.mxu2 %v255_v60  ;;  %v281_v1 = vmul.f32 %v255_v60, %v656_v20 }
 0x404   :  { %v277_v62 = vpop.f32.mrf.mxu2 }
 0x405   :  { %v280_v63 = vadd.f32 %v277_v62, %v259_v61 }
 0x407   :  { %358 = vtanh.f32 %v280_v63 }
 0x40d   :  { %v359_v0 = vpop.eup %358 }
 0x40e   :  { %v283_v2 = vmul.f32 %v359_v0, %v658_v21 }
 0x410   :  { %v284_v3 = vadd.f32 %v283_v2, %v281_v1 }
 0x412   :  { %286 = vst [vmem:[#allocation10 + $0x30] sm:$0xff] %v284_v3  ;;  %305 = vmatmul.f32.vlgmr.msrb.gmra.mxu3 %v284_v3  ;;  %v310_v8 = vmul.f32 %v284_v3, %v656_v20 }
 0x495   :  { %v306_v5 = vpop.f32.mrf.mxu3 }
 0x496   :  { %v309_v6 = vadd.f32 %v306_v5, %v288_v4 }
 0x498   :  { %360 = vtanh.f32 %v309_v6 }
 0x49e   :  { %v361_v7 = vpop.eup %360 }
 0x49f   :  { %v312_v9 = vmul.f32 %v361_v7, %v658_v21 }
 0x4a1   :  { %v313_v10 = vadd.f32 %v312_v9, %v310_v8 }
 0x4a3   :  { %315 = vst [vmem:[#allocation10 + $0x38] sm:$0xff] %v313_v10 }
 0x4a4   :  { %329 = dma.vmem_to_hbm [thread:$0]  %s322_s28, 1024, %s324_s4, [#allocation5], %s456_s21, %s456_s21, %s457_s22  }
 0x4a5   :  { %452 = dma.done.wait [#allocation5], 1024  }
 0x4a6   :  { %453 = vsyncadd [#allocation5], 4294966272 }
 0x4a7   :  { %334 = vsyncpa [#allocation4], 1 }
 0x4a8   :  { %335 = vsyncpa [#allocation9], 1 }
 0x4a9   :  { %336 = vsyncpa [#allocation5], 1 }
 0x4aa   :  { %337 = vsyncpa [#allocation6], 1 }

</bundles_post_ra>
